<compile_context>
chip_gen: v5e
topology: v5e:2x2
jax: 0.10.0
libtpu: 0.0.40
codegen_flags: <defaults>
</compile_context>

<pallas_src>
import jax
import jax.numpy as jnp
from jax.experimental import pallas as pl
from jax.experimental.pallas import tpu as pltpu

_LANE = 128
_SUB = 8


def _round_up(x, m):
    return ((x + m - 1) // m) * m


def _chip_budget():
    """Returns (vmem_capacity_bytes, per-input block byte budget)."""
    try:
        cap = int(pltpu.get_tpu_info().vmem_capacity_bytes)
    except Exception:
        cap = 128 * 1024 * 1024
    # v7x-class parts (64 MiB VMEM, ~3.2 TB/s HBM) want larger blocks to amortize the
    # fixed per-grid-step overhead; v5e/v6e are already near roofline at 4 MiB.
    if cap <= 64 * 1024 * 1024:
        return cap, 6 * 1024 * 1024
    return cap, 4 * 1024 * 1024


def _make_r2_partial_kernel(D, tb, td, grid_d):
    n_groups = td // _LANE
    # Only the last D grid block can run past D, and only some of its lane groups can be
    # partial -- decide statically per group which ones need the iota mask.
    group_needs_mask = [
        (grid_d - 1) * td + (g + 1) * _LANE > D for g in range(n_groups)
    ]
    need_any_mask = any(group_needs_mask)

    def kernel(labels_ref, preds_ref, w_ref, num_ref, lsum_ref, lsq_ref):
        di = pl.program_id(1)

        @pl.when(di == 0)
        def _init():
            num_ref[...] = jnp.zeros_like(num_ref)
            lsum_ref[...] = jnp.zeros_like(lsum_ref)
            lsq_ref[...] = jnp.zeros_like(lsq_ref)

        shape = (tb, _LANE)
        w = w_ref[0]
        # Hoisted broadcast constants (JAX does not CSE broadcasts across the group loop).
        w1_v = jnp.full(shape, w, jnp.float32)
        w2_v = w1_v + w1_v
        one_v = jnp.ones(shape, jnp.float32)

        if need_any_mask:
            col0 = di * td
            lane_iota = jax.lax.broadcasted_iota(jnp.int32, shape, 1)

        num_acc = lsum_acc = lsq_acc = None
        for g in range(n_groups):
            lo, hi = g * _LANE, (g + 1) * _LANE
            l = labels_ref[:, lo:hi].astype(jnp.float32)
            p = preds_ref[:, lo:hi].astype(jnp.float32)
            if group_needs_mask[g]:
                valid = (col0 + g * _LANE + lane_iota) < D
                l = jnp.where(valid, l, 0.0)
                p = jnp.where(valid, p, 0.0)
            d = p - l
            # Fused mask: labels <= 0 -> 2w ; labels <= 20 -> w ; else 1.
            m = jnp.where(l <= 0.0, w2_v, jnp.where(l <= 20.0, w1_v, one_v))
            n_g = m * (d * d)
            q_g = l * l
            if num_acc is None:
                num_acc, lsum_acc, lsq_acc = n_g, l, q_g
            else:
                num_acc += n_g
                lsum_acc += l
                lsq_acc += q_g

        num_ref[...] += num_acc
        lsum_ref[...] += lsum_acc
        lsq_ref[...] += lsq_acc

    return kernel


def r2_loss(labels, preds, w, *, tile=None):
    """labels, preds: (B, D) float arrays; w: scalar. Returns scalar f32 loss."""
    def _as_float(x):
        x = jnp.asarray(x)
        if x.dtype in (jnp.bfloat16, jnp.float16, jnp.float32):
            return x
        return x.astype(jnp.float32)

    labels = _as_float(labels)
    preds = _as_float(preds)
    assert labels.ndim == 2 and labels.shape == preds.shape
    B, D = labels.shape
    bytes_per_elem = max(jnp.dtype(labels.dtype).itemsize,
                         jnp.dtype(preds.dtype).itemsize)

    vmem_cap, block_budget = _chip_budget()
    block_elems = block_budget // bytes_per_elem
    D128 = _round_up(D, _LANE)

    if tile is None:
        td = min(D128, 4096)
        tb = min(_round_up(B, _SUB), 2048,
                 max(_SUB, (block_elems // td) // _SUB * _SUB))
        # Guarantee >= 2 blocks on the "parallel" B axis when B allows it (v7x megacore).
        if B > _SUB and pl.cdiv(B, tb) < 2:
            tb = max(_SUB, _round_up(pl.cdiv(B, 2), _SUB))
        # If tb is limited by B, grow td so each step stays near the byte budget.
        td = min(D128, 4096, max(td, (block_elems // tb) // _LANE * _LANE))
    else:
        tb, td = tile
        assert tb % _SUB == 0 and td % _LANE == 0

    grid = (pl.cdiv(B, tb), pl.cdiv(D, td))

    # Explicit VMEM limit: 2 inputs x 2 pipeline buffers + 3 lane-dense output blocks
    # (double-buffered) + per-group f32 temporaries, with slack.
    in_bytes = 2 * 2 * tb * td * bytes_per_elem
    out_bytes = 3 * 2 * tb * _LANE * 4
    tmp_bytes = 10 * tb * _LANE * 4
    vmem_limit = int(min(int(0.9 * vmem_cap),
                         max(32 * 1024 * 1024,
                             in_bytes + out_bytes + tmp_bytes + (4 << 20))))

    w_arr = jnp.asarray(w, jnp.float32).reshape((1,))
    kernel = _make_r2_partial_kernel(D, tb, td, grid[1])

    out_shapes = tuple(
        jax.ShapeDtypeStruct((B, _LANE), jnp.float32) for _ in range(3))

    num_p, lsum_p, lsq_p = pl.pallas_call(
        kernel,
        out_shape=out_shapes,
        grid=grid,
        in_specs=[
            pl.BlockSpec((tb, td), lambda bi, di: (bi, di)),    # labels tile
            pl.BlockSpec((tb, td), lambda bi, di: (bi, di)),    # preds tile
            pl.BlockSpec(memory_space=pltpu.MemorySpace.SMEM),  # w scalar
        ],
        out_specs=tuple(
            pl.BlockSpec((tb, _LANE), lambda bi, di: (bi, 0)) for _ in range(3)),
        compiler_params=pltpu.CompilerParams(
            dimension_semantics=("parallel", "arbitrary"),
            vmem_limit_bytes=vmem_limit,
        ),
    )(labels, preds, w_arr)

    # Tiny epilogue on (B, 128) lane-partials.
    num = jnp.sum(num_p, axis=1)            # per-row weighted SSE
    lsum = jnp.sum(lsum_p, axis=1)          # per-row sum(labels)
    lsq = jnp.sum(lsq_p, axis=1)            # per-row sum(labels^2)
    mu = jnp.sum(lsum) / (B * D)            # global labels.mean()
    den = lsq - 2.0 * mu * lsum + (D * mu) * mu   # per-row sum((l - mu)^2)
    return jnp.mean(num / den)


def _r2_loss_ref(labels, preds, w):
    labels = labels.astype(jnp.float32)
    preds = preds.astype(jnp.float32)
    mask = jnp.ones_like(labels)
    mask = jnp.where(labels <= 20.0, w, mask)
    mask = jnp.where(labels <= 0.0, w * 2.0, mask)
    num = jnp.sum(mask * (preds - labels) ** 2, axis=1)
    den = jnp.sum((labels - jnp.mean(labels)) ** 2, axis=1)
    return jnp.mean(num / den)


if __name__ == "__main__":
    key = jax.random.PRNGKey(0)
    w = 0.25

    cases = [
        ((8, 128), None),        # exact single tile
        ((10, 200), None),       # ragged B rows + ragged D lane-group mask, 2 B-blocks
        ((24, 384), None),       # multi lane-group fold, 2 B-blocks
        ((20, 640), (8, 256)),   # forced small tiles: multi-step D accumulation + ragged tails
    ]
    for (B, D), tile in cases:
        key, k1, k2 = jax.random.split(key, 3)
        # labels span <=0, <=20 and >20 so every mask branch is exercised
        labels = jax.random.uniform(k1, (B, D), jnp.float32, minval=-10.0, maxval=40.0)
        preds = labels + jax.random.normal(k2, (B, D), jnp.float32) * 2.0

        loss = r2_loss(labels, preds, w, tile=tile)
        jax.block_until_ready(loss)

        ref = _r2_loss_ref(labels, preds, w)
        assert jnp.allclose(loss, ref, rtol=1e-4, atol=1e-6), ((B, D), loss, ref)

    print("KERNEL_OK")
</pallas_src>

<mosaic_0001>
module attributes {stable_mosaic.version = 11 : i64} {
  func.func @kernel(%arg0: i32, %arg1: i32, %arg2: memref<8x128xf32, #tpu.memory_space<vmem>>, %arg3: memref<8x128xf32, #tpu.memory_space<vmem>>, %arg4: memref<1xf32, #tpu.memory_space<smem>>, %arg5: memref<8x128xf32, #tpu.memory_space<vmem>>, %arg6: memref<8x128xf32, #tpu.memory_space<vmem>>, %arg7: memref<8x128xf32, #tpu.memory_space<vmem>>) attributes {dimension_semantics = [#tpu.dimension_semantics<parallel>, #tpu.dimension_semantics<arbitrary>], iteration_bounds = array<i64: 1, 1>, scalar_prefetch = 0 : i64, scratch_operands = 0 : i64, tpu.core_type = #tpu.core_type<tc>, window_params = [{transform_indices = @transform_0, window_bounds = array<i64: 8, 128>}, {transform_indices = @transform_1, window_bounds = array<i64: 8, 128>}, {transform_indices = @transform_2, window_bounds = array<i64: 1>}, {transform_indices = @transform_3, window_bounds = array<i64: 8, 128>}, {transform_indices = @transform_4, window_bounds = array<i64: 8, 128>}, {transform_indices = @transform_5, window_bounds = array<i64: 8, 128>}]} {
    %c0_i32 = arith.constant 0 : i32
    %0 = arith.cmpi eq, %arg1, %c0_i32 : i32
    %1 = arith.extui %0 : i1 to i32
    %c0_i32_0 = arith.constant 0 : i32
    %2 = arith.cmpi ne, %1, %c0_i32_0 : i32
    scf.if %2 {
      %cst_19 = arith.constant 0.000000e+00 : f32
      %28 = vector.broadcast %cst_19 : f32 to vector<8x128xf32>
      %c0_20 = arith.constant 0 : index
      %c0_21 = arith.constant 0 : index
      %29 = vector.load %arg5[%c0_20, %c0_21] : memref<8x128xf32, #tpu.memory_space<vmem>>, vector<8x128xf32>
      tpu.vector_store %arg5[%c0_20, %c0_21], %28 {strides = array<i32>} : memref<8x128xf32, #tpu.memory_space<vmem>>, vector<8x128xf32>,
      %cst_22 = arith.constant 0.000000e+00 : f32
      %30 = vector.broadcast %cst_22 : f32 to vector<8x128xf32>
      %c0_23 = arith.constant 0 : index
      %c0_24 = arith.constant 0 : index
      %31 = vector.load %arg6[%c0_23, %c0_24] : memref<8x128xf32, #tpu.memory_space<vmem>>, vector<8x128xf32>
      tpu.vector_store %arg6[%c0_23, %c0_24], %30 {strides = array<i32>} : memref<8x128xf32, #tpu.memory_space<vmem>>, vector<8x128xf32>,
      %cst_25 = arith.constant 0.000000e+00 : f32
      %32 = vector.broadcast %cst_25 : f32 to vector<8x128xf32>
      %c0_26 = arith.constant 0 : index
      %c0_27 = arith.constant 0 : index
      %33 = vector.load %arg7[%c0_26, %c0_27] : memref<8x128xf32, #tpu.memory_space<vmem>>, vector<8x128xf32>
      tpu.vector_store %arg7[%c0_26, %c0_27], %32 {strides = array<i32>} : memref<8x128xf32, #tpu.memory_space<vmem>>, vector<8x128xf32>,
    } else {
    }
    %c0 = arith.constant 0 : index
    %3 = memref.load %arg4[%c0] : memref<1xf32, #tpu.memory_space<smem>>
    %4 = vector.broadcast %3 : f32 to vector<8x128xf32>
    %5 = arith.addf %4, %4 : vector<8x128xf32>
    %cst = arith.constant 1.000000e+00 : f32
    %6 = vector.broadcast %cst : f32 to vector<8x128xf32>
    %c0_1 = arith.constant 0 : index
    %c0_2 = arith.constant 0 : index
    %7 = vector.load %arg2[%c0_1, %c0_2] : memref<8x128xf32, #tpu.memory_space<vmem>>, vector<8x128xf32>
    %c0_3 = arith.constant 0 : index
    %c0_4 = arith.constant 0 : index
    %8 = vector.load %arg3[%c0_3, %c0_4] : memref<8x128xf32, #tpu.memory_space<vmem>>, vector<8x128xf32>
    %9 = arith.subf %8, %7 : vector<8x128xf32>
    %cst_5 = arith.constant 0.000000e+00 : f32
    %10 = vector.broadcast %cst_5 : f32 to vector<8x128xf32>
    %11 = arith.cmpf ole, %7, %10 : vector<8x128xf32>
    %cst_6 = arith.constant 2.000000e+01 : f32
    %12 = vector.broadcast %cst_6 : f32 to vector<8x128xf32>
    %13 = arith.cmpf ole, %7, %12 : vector<8x128xf32>
    %14 = arith.select %13, %4, %6 : vector<8x128xi1>, vector<8x128xf32>
    %15 = arith.select %11, %5, %14 : vector<8x128xi1>, vector<8x128xf32>
    %16 = arith.mulf %9, %9 : vector<8x128xf32>
    %17 = arith.mulf %15, %16 : vector<8x128xf32>
    %18 = arith.mulf %7, %7 : vector<8x128xf32>
    %c0_7 = arith.constant 0 : index
    %c0_8 = arith.constant 0 : index
    %19 = vector.load %arg5[%c0_7, %c0_8] : memref<8x128xf32, #tpu.memory_space<vmem>>, vector<8x128xf32>
    %20 = arith.addf %19, %17 : vector<8x128xf32>
    %c0_9 = arith.constant 0 : index
    %c0_10 = arith.constant 0 : index
    %21 = vector.load %arg5[%c0_9, %c0_10] : memref<8x128xf32, #tpu.memory_space<vmem>>, vector<8x128xf32>
    tpu.vector_store %arg5[%c0_9, %c0_10], %20 {strides = array<i32>} : memref<8x128xf32, #tpu.memory_space<vmem>>, vector<8x128xf32>,
    %c0_11 = arith.constant 0 : index
    %c0_12 = arith.constant 0 : index
    %22 = vector.load %arg6[%c0_11, %c0_12] : memref<8x128xf32, #tpu.memory_space<vmem>>, vector<8x128xf32>
    %23 = arith.addf %22, %7 : vector<8x128xf32>
    %c0_13 = arith.constant 0 : index
    %c0_14 = arith.constant 0 : index
    %24 = vector.load %arg6[%c0_13, %c0_14] : memref<8x128xf32, #tpu.memory_space<vmem>>, vector<8x128xf32>
    tpu.vector_store %arg6[%c0_13, %c0_14], %23 {strides = array<i32>} : memref<8x128xf32, #tpu.memory_space<vmem>>, vector<8x128xf32>,
    %c0_15 = arith.constant 0 : index
    %c0_16 = arith.constant 0 : index
    %25 = vector.load %arg7[%c0_15, %c0_16] : memref<8x128xf32, #tpu.memory_space<vmem>>, vector<8x128xf32>
    %26 = arith.addf %25, %18 : vector<8x128xf32>
    %c0_17 = arith.constant 0 : index
    %c0_18 = arith.constant 0 : index
    %27 = vector.load %arg7[%c0_17, %c0_18] : memref<8x128xf32, #tpu.memory_space<vmem>>, vector<8x128xf32>
    tpu.vector_store %arg7[%c0_17, %c0_18], %26 {strides = array<i32>} : memref<8x128xf32, #tpu.memory_space<vmem>>, vector<8x128xf32>,
    return
  }
  func.func @transform_0(%arg0: i32, %arg1: i32) -> (i32, i32) {
    %c0_i32 = arith.constant 0 : i32
    return %arg0, %arg1 : i32, i32
  }
  func.func @transform_1(%arg0: i32, %arg1: i32) -> (i32, i32) {
    %c0_i32 = arith.constant 0 : i32
    return %arg0, %arg1 : i32, i32
  }
  func.func @transform_2(%arg0: i32, %arg1: i32) -> i32 {
    %c0_i32 = arith.constant 0 : i32
    %c0_i32_0 = arith.constant 0 : i32
    return %c0_i32 : i32
  }
  func.func @transform_3(%arg0: i32, %arg1: i32) -> (i32, i32) {
    %c0_i32 = arith.constant 0 : i32
    %c0_i32_0 = arith.constant 0 : i32
    return %arg0, %c0_i32 : i32, i32
  }
  func.func @transform_4(%arg0: i32, %arg1: i32) -> (i32, i32) {
    %c0_i32 = arith.constant 0 : i32
    %c0_i32_0 = arith.constant 0 : i32
    return %arg0, %c0_i32 : i32, i32
  }
  func.func @transform_5(%arg0: i32, %arg1: i32) -> (i32, i32) {
    %c0_i32 = arith.constant 0 : i32
    %c0_i32_0 = arith.constant 0 : i32
    return %arg0, %c0_i32 : i32, i32
  }
}

</mosaic_0001>

<bundles_post_ra>
// kernel: tpu_custom_call.1
= control target key start
LH: loop header
LB: loop body
LE: loop exit
PB: predicated region body
PF: predicated region fallthrough
CT: control target
= control target key end

     0   :  { %12 = vsyncpa [#allocation4], 0  ;;  %s313_s0 = inlined_call_operand.hbm [shape: f32[8,128], index: 0, kind: input, shape index: {}]   ;;  %s314_s1 = inlined_call_operand.hbm [shape: f32[8,128], index: 1, kind: input, shape index: {}]   ;;  %s315_s2 = inlined_call_operand.<no memory space> [shape: f32[1], index: 2, kind: input, shape index: {}]   ;;  %s316_s3 = inlined_call_operand.hbm [shape: f32[8,128], index: 3, kind: output, shape index: {0}]   ;;  %s317_s4 = inlined_call_operand.hbm [shape: f32[8,128], index: 4, kind: output, shape index: {1}]   ;;  %s318_s5 = inlined_call_operand.hbm [shape: f32[8,128], index: 5, kind: output, shape index: {2}]  }
   0x1   :  { %13 = vsyncpa [#allocation7], 0 }
   0x2   :  { %14 = vsyncpa [#allocation5], 0 }
   0x3   :  { %15 = vsyncpa [#allocation10], 0  ;;  %s21_s20 = sshll.u32 %s313_s0, 4  ;;  %s260_s21 = smov [#allocation3]   ;;  %s22_s20 = int_to_ptr.hbm [resolvable:$true] %s21_s20 }
   0x4   :  { %s23_s22 = sshll.u32 %s260_s21, 4  ;;  %s32_s25 = sshll.u32 %s314_s1, 4  ;;  %s24_s22 = int_to_ptr.vmem [resolvable:$true] %s23_s22  ;;  %s33_s25 = int_to_ptr.hbm [resolvable:$true] %s32_s25 }
   0x5   :  { %26 = dma.hbm_to_vmem [thread:$0]  %s22_s20, 128, %s24_s22, [#allocation4]  }
   0x6   :  { %s261_s26 = smov [#allocation6]  }
   0x7   :  { %s34_s27 = sshll.u32 %s261_s26, 4  ;;  %s35_s27 = int_to_ptr.vmem [resolvable:$true] %s34_s27 }
   0x8   :  { %37 = dma.hbm_to_vmem [thread:$0]  %s33_s25, 128, %s35_s27, [#allocation7]  }
   0x9   :  { %252 = dma.done.wait [#allocation4], 128  }
   0xa   :  { %253 = vsyncadd [#allocation4], 4294967168 }
   0xb   :  { %254 = dma.done.wait [#allocation7], 128  }
   0xc   :  { %255 = vsyncadd [#allocation7], 4294967168  ;;  %v56_v0 = vstv %s315_s2  ;;  %s95_s6 = sshll.u32 %s317_s4, 4  ;;  %s262_s7 = smov [#allocation9]   ;;  %v58_v2 = vld [vmem:[#allocation3] sm:$0xff]  ;;  %v59_v3 = vld [vmem:[#allocation6] sm:$0xff]  ;;  %s96_s6 = int_to_ptr.hbm [resolvable:$true] %s95_s6 }
   0xd   :  { %s93_s1 = sshll.u32 %s262_s7, 4  ;;  %v57_v1 = vadd.f32 %v56_v0, %v56_v0  ;;  %s263_s8 = smov [#allocation11]   ;;  %v60_v4 = vsub.f32 %v59_v3, %v58_v2  ;;  %vm61_vm0 = vcmp.le.f32.partialorder %v58_v2, 0.0  ;;  %vm62_vm1 = vcmp.le.f32.partialorder %v58_v2, 20.0  ;;  %73 = vst [vmem:[#allocation9] sm:$0xff] %v58_v2  ;;  %s94_s1 = int_to_ptr.vmem [resolvable:$true] %s93_s1 }
   0xe   :  { %s104_s9 = sshll.u32 %s263_s8, 4  ;;  %s106_s12 = sshll.u32 %s318_s5, 4  ;;  %v63_v5 = vsel %vm62_vm1, %v56_v0, 1.0  ;;  %v67_v6 = vmul.f32 %v58_v2, %v58_v2  ;;  %s105_s9 = int_to_ptr.vmem [resolvable:$true] %s104_s9  ;;  %s107_s12 = int_to_ptr.hbm [resolvable:$true] %s106_s12 }
   0xf   :  { %s264_s2 = smov [#allocation8]   ;;  %s84_s15 = sshll.u32 %s316_s3, 4  ;;  %v64_v7 = vsel %vm61_vm0, %v57_v1, %v63_v5  ;;  %v65_v8 = vmul.f32 %v60_v4, %v60_v4  ;;  %s85_s15 = int_to_ptr.hbm [resolvable:$true] %s84_s15 }
  0x10   :  { %s82_s4 = sshll.u32 %s264_s2, 4  ;;  %76 = vst [vmem:[#allocation11] sm:$0xff] %v67_v6  ;;  %s83_s4 = int_to_ptr.vmem [resolvable:$true] %s82_s4 }
  0x11   :  { %98 = dma.vmem_to_hbm [thread:$0]  %s94_s1, 128, %s96_s6, [#allocation10]   ;;  %v66_v9 = vmul.f32 %v65_v8, %v64_v7 }
  0x12   :  { %109 = dma.vmem_to_hbm [thread:$0]  %s105_s9, 128, %s107_s12, [#allocation10]  }
  0x13   :  { %70 = vst [vmem:[#allocation8] sm:$0xff] %v66_v9 }
  0x14   :  { %87 = dma.vmem_to_hbm [thread:$0]  %s83_s4, 128, %s85_s15, [#allocation5]  }
  0x15   :  { %256 = dma.done.wait [#allocation5], 128  }
  0x16   :  { %257 = vsyncadd [#allocation5], 4294967168 }
  0x17   :  { %258 = dma.done.wait [#allocation10], 256  }
  0x18   :  { %259 = vsyncadd [#allocation10], 4294967040 }
  0x19   :  { %122 = vsyncpa [#allocation4], 1 }
  0x1a   :  { %123 = vsyncpa [#allocation7], 1 }
  0x1b   :  { %124 = vsyncpa [#allocation5], 1 }
  0x1c   :  { %125 = vsyncpa [#allocation10], 1 }

</bundles_post_ra>
